<compile_context>
chip_gen: v6e
topology: v6e:2x2x1
jax: 0.10.0
libtpu: 0.0.40
codegen_flags: <defaults>
</compile_context>

<pallas_src>
import jax
import jax.numpy as jnp
from jax import lax
from jax.experimental import pallas as pl
from jax.experimental.pallas import tpu as pltpu


def _round_up(n, m):
    return ((n + m - 1) // m) * m


def _cdiv(a, b):
    return (a + b - 1) // b


def _logreg_kernel(bias_ref, x_ref, w_ref, o_ref):
    # bias_ref: (1, 1) f32 in SMEM (scalar, no VMEM tile / per-step DMA)
    # x_ref:    (tile_b, D) in the upstream dtype (double-buffered by Pallas)
    # w_ref:    (1, D) lane-dense weight tile, resident across the grid
    # o_ref:    (1, 1, tile_b) f32 lane-dense output tile
    #
    # MXU contraction over D with batch mapped to the *lane* axis of the
    # result: (1, D) . (tile_b, D)^T -> (1, tile_b).  Keeps XLU/VALU free and
    # makes the epilogue (bias, exp, reciprocal, store) lane-dense.
    z = lax.dot_general(
        w_ref[...], x_ref[...],
        dimension_numbers=(((1,), (1,)), ((), ())),
        preferred_element_type=jnp.float32,
        precision=lax.Precision.HIGHEST,
    )                                                   # (1, tile_b) f32
    z = z + bias_ref[0, 0]                              # scalar bias from SMEM
    # Exact reciprocal: on the lane-dense (1, tile_b) row this is tile_b/128
    # vregs of work -- negligible -- and keeps the 1e-5 numerical match.
    sig = pl.reciprocal(1.0 + jnp.exp(-z))
    o_ref[...] = sig.reshape(o_ref.shape).astype(o_ref.dtype)


def logistic_regression_forward(x, weight, bias, *, max_rows_per_tile=None):
    """Pallas TPU forward for torch.sigmoid(nn.Linear(D, 1)(x)).

    x:      (B, D)  -- kept in its upstream dtype (bf16 stays bf16 end-to-end)
    weight: (1, D)  -- PyTorch nn.Linear weight layout
    bias:   (1,)
    returns (B, 1) float32
    """
    B, D = x.shape
    itemsize = jnp.dtype(x.dtype).itemsize
    sublane = 8 if itemsize >= 4 else (16 if itemsize == 2 else 32)

    # Generation-aware VMEM budget (v7x: 64 MiB/TC, v5e/v6e: 128 MiB).
    try:
        vmem_cap = int(getattr(pltpu.get_tpu_info(), "vmem_capacity_bytes",
                               64 * 1024 * 1024))
    except Exception:
        vmem_cap = 64 * 1024 * 1024
    per_buffer_budget = min(32 * 1024 * 1024, vmem_cap // 4)   # x is double-buffered
    vmem_limit = min(96 * 1024 * 1024, (vmem_cap * 3) // 4)

    # Batch tile: as many rows as fit the per-buffer budget (big tiles amortize
    # the ~0.35us/step overhead), rounded to the sublane multiple, never more
    # rows than the (rounded-up) batch.
    row_bytes = max(1, D * itemsize)
    tile_b = max(sublane, (per_buffer_budget // row_bytes) // sublane * sublane)
    # TODO(synk): if even `sublane` rows of x exceed the VMEM budget
    # (multi-million D), this needs a D-tiled accumulating grid instead.
    tile_b = min(tile_b, _round_up(B, sublane))

    # Keep >=2 grid steps when the batch is big enough: feeds both v7x
    # TensorCores under dimension_semantics=("parallel",) and keeps the x DMA
    # double-buffered.  (Skipped for small batches where step overhead wins.)
    min_split_rows = max(sublane, 1024)
    if _cdiv(B, tile_b) < 2 and B >= 2 * min_split_rows:
        tile_b = max(min_split_rows, _round_up(_cdiv(B, 2), sublane))

    if max_rows_per_tile is not None:
        tile_b = max(sublane, min(tile_b, (max_rows_per_tile // sublane) * sublane))

    num_tiles = _cdiv(B, tile_b)    # no jnp.pad: ragged last block is masked by Pallas

    w_row = weight.reshape(1, D).astype(x.dtype)        # lane-dense weight, MXU dtype = x dtype
    b_smem = bias.reshape(1, 1).astype(jnp.float32)     # scalar bias for SMEM

    out = pl.pallas_call(
        _logreg_kernel,
        out_shape=jax.ShapeDtypeStruct((num_tiles, 1, tile_b), jnp.float32),
        grid=(num_tiles,),
        in_specs=[
            pl.BlockSpec(memory_space=pltpu.SMEM),            # bias: whole (1,1) in SMEM
            pl.BlockSpec((tile_b, D), lambda i: (i, 0)),      # x: pipelined batch tiles
            pl.BlockSpec((1, D), lambda i: (0, 0)),           # weight: resident tile
        ],
        out_specs=pl.BlockSpec((1, 1, tile_b), lambda i: (i, 0, 0)),  # lane-dense rows
        compiler_params=pltpu.CompilerParams(
            dimension_semantics=("parallel",),                # shard batch over v7x TCs
            vmem_limit_bytes=vmem_limit,
        ),
        cost_estimate=pl.CostEstimate(
            flops=2 * B * D,
            transcendentals=B,
            bytes_accessed=B * D * itemsize + D * itemsize + B * 4,
        ),
    )(b_smem, x, w_row)

    # (num_tiles, 1, tile_b) -> (B, 1); contiguous reshape + a B*4-byte slice.
    return out.reshape(-1)[:B].reshape(B, 1)


if __name__ == "__main__":
    key = jax.random.PRNGKey(0)
    kx, kw, kb, kx2 = jax.random.split(key, 4)

    # Small shapes consistent with nn.Linear(input_dim=32, 1), batch 8.
    B, D = 8, 32
    bound = 1.0 / jnp.sqrt(D)
    x = jax.random.normal(kx, (B, D), dtype=jnp.float32)
    weight = jax.random.uniform(kw, (1, D), minval=-bound, maxval=bound,
                                dtype=jnp.float32)            # nn.Linear weight (1, D)
    bias = jax.random.uniform(kb, (1,), minval=-bound, maxval=bound,
                              dtype=jnp.float32)              # nn.Linear bias (1,)

    out = jax.block_until_ready(logistic_regression_forward(x, weight, bias))
    ref = jax.nn.sigmoid(
        jnp.dot(x, weight.T, precision=lax.Precision.HIGHEST) + bias)
    assert out.shape == (B, 1)
    assert jnp.allclose(out, ref, atol=1e-5, rtol=1e-5)

    # Second check: non-multiple batch + multi-step grid (exercises the
    # pad-free ragged last block, multi-step pipelining, lane-dense output).
    B2 = 300
    x2 = jax.random.normal(kx2, (B2, D), dtype=jnp.float32)
    out2 = jax.block_until_ready(
        logistic_regression_forward(x2, weight, bias, max_rows_per_tile=128))
    ref2 = jax.nn.sigmoid(
        jnp.dot(x2, weight.T, precision=lax.Precision.HIGHEST) + bias)
    assert out2.shape == (B2, 1)
    assert jnp.allclose(out2, ref2, atol=1e-5, rtol=1e-5)

    print("KERNEL_OK")
</pallas_src>

<mosaic_0001>
module attributes {stable_mosaic.version = 11 : i64} {
  func.func @_logreg_kernel(%arg0: i32, %arg1: memref<1x1xf32, #tpu.memory_space<smem>>, %arg2: memref<8x32xf32, #tpu.memory_space<vmem>>, %arg3: memref<1x32xf32, #tpu.memory_space<vmem>>, %arg4: memref<1x1x8xf32, #tpu.memory_space<vmem>>) attributes {dimension_semantics = [#tpu.dimension_semantics<parallel>], iteration_bounds = array<i64: 1>, scalar_prefetch = 0 : i64, scratch_operands = 0 : i64, tpu.core_type = #tpu.core_type<tc>, window_params = [{transform_indices = @transform_0, window_bounds = array<i64: 1, 1>}, {transform_indices = @transform_1, window_bounds = array<i64: 8, 32>}, {pipeline_mode = #tpu.pipeline_mode<synchronous>, transform_indices = @transform_2, window_bounds = array<i64: 1, 32>}, {transform_indices = @transform_3, window_bounds = array<i64: 1, 1, 8>}]} {
    %c0 = arith.constant 0 : index
    %c0_0 = arith.constant 0 : index
    %0 = vector.load %arg3[%c0, %c0_0] : memref<1x32xf32, #tpu.memory_space<vmem>>, vector<1x32xf32>
    %c0_1 = arith.constant 0 : index
    %c0_2 = arith.constant 0 : index
    %1 = vector.load %arg2[%c0_1, %c0_2] : memref<8x32xf32, #tpu.memory_space<vmem>>, vector<8x32xf32>
    %cst = arith.constant dense<0.000000e+00> : vector<1x8xf32>
    %2 = tpu.matmul %0, %1, %cst {dimension_numbers = #tpu.dot_dimension_numbers<[1], [1], [0], [0], [0, 0, 1, 0], [], []>, precision = #tpu.contract_precision<fp32>} : vector<1x32xf32>, vector<8x32xf32>, vector<1x8xf32> -> vector<1x8xf32>
    %c0_3 = arith.constant 0 : index
    %c0_4 = arith.constant 0 : index
    %3 = memref.load %arg1[%c0_3, %c0_4] : memref<1x1xf32, #tpu.memory_space<smem>>
    %4 = vector.broadcast %3 : f32 to vector<1x8xf32>
    %5 = arith.addf %2, %4 : vector<1x8xf32>
    %cst_5 = arith.constant 0.000000e+00 : f32
    %6 = vector.broadcast %cst_5 : f32 to vector<1x8xf32>
    %7 = arith.subf %6, %5 : vector<1x8xf32>
    %8 = math.exp %7 : vector<1x8xf32>
    %cst_6 = arith.constant 1.000000e+00 : f32
    %9 = vector.broadcast %cst_6 : f32 to vector<1x8xf32>
    %10 = arith.addf %9, %8 : vector<1x8xf32>
    %11 = tpu.reciprocal %10 : vector<1x8xf32> -> vector<1x8xf32>
    %12 = vector.shape_cast %11 : vector<1x8xf32> to vector<1x1x8xf32>
    %c0_7 = arith.constant 0 : index
    %c0_8 = arith.constant 0 : index
    %c0_9 = arith.constant 0 : index
    %13 = vector.load %arg4[%c0_7, %c0_8, %c0_9] : memref<1x1x8xf32, #tpu.memory_space<vmem>>, vector<1x1x8xf32>
    tpu.vector_store %arg4[%c0_7, %c0_8, %c0_9], %12 {strides = array<i32>} : memref<1x1x8xf32, #tpu.memory_space<vmem>>, vector<1x1x8xf32>,
    return
  }
  func.func @transform_0(%arg0: i32) -> (i32, i32) {
    %c0_i32 = arith.constant 0 : i32
    %c0_i32_0 = arith.constant 0 : i32
    %c0_i32_1 = arith.constant 0 : i32
    return %c0_i32, %c0_i32_0 : i32, i32
  }
  func.func @transform_1(%arg0: i32) -> (i32, i32) {
    %c0_i32 = arith.constant 0 : i32
    %c0_i32_0 = arith.constant 0 : i32
    return %arg0, %c0_i32 : i32, i32
  }
  func.func @transform_2(%arg0: i32) -> (i32, i32) {
    %c0_i32 = arith.constant 0 : i32
    %c0_i32_0 = arith.constant 0 : i32
    %c0_i32_1 = arith.constant 0 : i32
    return %c0_i32, %c0_i32_0 : i32, i32
  }
  func.func @transform_3(%arg0: i32) -> (i32, i32, i32) {
    %c0_i32 = arith.constant 0 : i32
    %c0_i32_0 = arith.constant 0 : i32
    %c0_i32_1 = arith.constant 0 : i32
    return %arg0, %c0_i32, %c0_i32_0 : i32, i32, i32
  }
}

</mosaic_0001>

<bundles_post_ra>
// kernel: tpu_custom_call.1
= control target key start
LH: loop header
LB: loop body
LE: loop exit
PB: predicated region body
PF: predicated region fallthrough
CT: control target
= control target key end

     0   :  { %9 = vsyncpa [#allocation4], 0  ;;  %s643_s0 = inlined_call_operand.<no memory space> [shape: f32[1,1], index: 0, kind: input, shape index: {}]   ;;  %s644_s1 = inlined_call_operand.hbm [shape: f32[8,32], index: 1, kind: input, shape index: {}]   ;;  %s645_s2 = inlined_call_operand.vmem [shape: f32[1,32], index: 2, kind: input, shape index: {}]   ;;  %s646_s3 = inlined_call_operand.hbm [shape: f32[1,1,8], index: 3, kind: output, shape index: {}]  }
   0x1   :  { %10 = vsyncpa [#allocation5], 0  ;;  %s601_s12 = smov [#allocation3]  }
   0x2   :  { %s19_s13 = sshll.u32 %s601_s12, 4  ;;  %s20_s13 = int_to_ptr.vmem [resolvable:$true] %s19_s13 }
   0x3   :  { %s565_s14 = scalar_lea.vmem %s20_s13, 128  ;;  %p570_p1 = scmp.lt.s32.totalorder %s20_s13, %s20_s13 }
   0x4   :  { %p566_p0 = scmp.ne.s32.totalorder %s20_s13, %s565_s14  ;;  %p571_p2 = scmp.lt.s32.totalorder %s565_s14, %s565_s14 }
   0x6   :  { %p572_p3 = por %p571_p2, %p570_p1 }
   0x8   :  { %p573_p4 = pnand %p572_p3, %p566_p0 }
   0xa   :  { %576 = shalt.err (!%p573_p4)
}
   0xb   :  { %22 = dma.hbm_to_vmem [thread:$0]  %s644_s1, 128, %s20_s13, [#allocation4]  }
   0xc   :  { %597 = dma.done.wait [#allocation4], 128  }
   0xd   :  { %598 = vsyncadd [#allocation4], 4294967168  ;;  %v602_v0 = vmov 0.0   ;;  %vm603_vm0 = vmmov 0   ;;  %vm32_vm1 = vcmask 261120   ;;  %v29_v1 = vld [vmem:[#allocation3] sm:$0xff]  ;;  %v31_v15 = vstv %s643_s0 }
   0xe   :  { %519 = vmatprep.subr.mxu0 %v602_v0  ;;  %521 = vmatprep.mubr.msk.f32.mxu0 %vm603_vm0, %v602_v0  ;;  %v28_v2 = vld [vmem:[%s645_s2] sm:$0x1]  ;;  %v37_v3 = vsel %vm32_vm1, %v29_v1, 0  ;;  %s604_s0 = smov [#allocation6]   ;;  %vm490_vm2 = vcmask 57344  }
   0xf   :  { %524 = vmatprep.subr.mxu1 %v602_v0  ;;  %526 = vmatprep.mubr.msk.f32.mxu1 %vm603_vm0, %v602_v0  ;;  %v34_v4 = vsel %vm32_vm1, %v28_v2, 0  ;;  %v70_v5 = vand.u32 4294901760, %v37_v3  ;;  %s498_s19 = sshll.u32 %s604_s0, 4  ;;  %s499_s19 = int_to_ptr.vmem [resolvable:$true] %s498_s19 }
  0x10   :  { %v105_v6 = vand.u32 4294901760, %v34_v4  ;;  %s577_s20 = scalar_lea.vmem %s499_s19, 16  ;;  %s581_s21 = scalar_lea.vmem %s499_s19, 32 }
  0x11   :  { %520 = vmatpush3.xpose.msra.mxu0 %v70_v5  ;;  %v147_v8 = vsub.f32 %v37_v3, %v70_v5  ;;  %p578_p5 = scmp.ne.s32.totalorder %s499_s19, %s577_s20  ;;  %p582_p6 = scmp.lt.s32.totalorder %s499_s19, %s499_s19 }
  0x12   :  { %v106_v7 = vsub.f32 %v34_v4, %v105_v6  ;;  %529 = vmatprep.subr.mxu0 %v602_v0  ;;  %p583_p7 = scmp.lt.s32.totalorder %s581_s21, %s577_s20 }
  0x13   :  { %v148_v10 = vand.u32 4294901760, %v147_v8 }
  0x14   :  { %v107_v9 = vand.u32 4294901760, %v106_v7  ;;  %p584_p8 = por %p583_p7, %p582_p6 }
  0x15   :  { %v149_v12 = vsub.f32 %v147_v8, %v148_v10 }
  0x16   :  { %v108_v11 = vsub.f32 %v106_v7, %v107_v9  ;;  %p585_p9 = pnand %p584_p8, %p578_p5 }
  0x17   :  { %v150_v14 = vand.u32 4294901760, %v149_v12 }
  0x18   :  { %v109_v13 = vand.u32 4294901760, %v108_v11 }
  0x19   :  { %525 = vmatpush3.xpose.msra.mxu1 %v150_v14 }
  0x1a   :  { %522 = vmatmul.mubr.f32.vlgmr.msra.gmra.mxu0 %v109_v13  ;;  %534 = vmatprep.subr.mxu1 %v602_v0 }
  0x1b   :  { %530 = vmatpush3.xpose.msra.mxu0 %v147_v8  ;;  %531 = vmatprep.mubr.msk.f32.mxu0 %vm603_vm0, %v602_v0 }
  0x1c   :  { %539 = vmatprep.subr.mxu0 %v602_v0  ;;  %527 = vmatmul.mubr.f32.vlgmr.msra.gmra.mxu1 %v105_v6 }
  0x1d   :  { %535 = vmatpush3.xpose.msra.mxu1 %v70_v5  ;;  %536 = vmatprep.mubr.msk.f32.mxu1 %vm603_vm0, %v602_v0 }
  0x1e   :  { %532 = vmatmul.mubr.f32.vlgmr.msra.gmra.mxu0 %v106_v7  ;;  %544 = vmatprep.subr.mxu1 %v602_v0 }
  0x1f   :  { %540 = vmatpush3.xpose.msra.mxu0 %v148_v10  ;;  %541 = vmatprep.mubr.msk.f32.mxu0 %vm603_vm0, %v602_v0 }
  0x20   :  { %537 = vmatmul.mubr.f32.vlgmr.msra.gmra.mxu1 %v107_v9 }
  0x21   :  { %545 = vmatpush3.xpose.msra.mxu1 %v70_v5  ;;  %546 = vmatprep.mubr.msk.f32.mxu1 %vm603_vm0, %v602_v0 }
  0x22   :  { %542 = vmatmul.mubr.f32.vlgmr.msra.gmra.mxu0 %v105_v6 }
  0x24   :  { %547 = vmatmul.mubr.f32.vlgmr.msra.gmra.mxu1 %v105_v6 }
  0xda   :  { %v111_v16 = vpop.f32.mrf.mxu0 }
  0xdb   :  { %v112_v17 = vadd.f32 %v111_v16, %v31_v15 }
  0xdc   :  { %v523_v18 = vpop.f32.mrf.mxu0  ;;  %v187_v19 = vpop.f32.mrf.mxu1 }
  0xdd   :  { %v188_v20 = vadd.f32 %v187_v19, %v112_v17 }
  0xde   :  { %v261_v21 = vpop.f32.mrf.mxu0  ;;  %v528_v22 = vpop.f32.mrf.mxu1 }
  0xdf   :  { %v262_v23 = vadd.f32 %v261_v21, %v188_v20 }
  0xe0   :  { %v533_v24 = vpop.f32.mrf.mxu0  ;;  %v335_v25 = vpop.f32.mrf.mxu1 }
  0xe1   :  { %v336_v26 = vadd.f32 %v335_v25, %v262_v23 }
  0xe2   :  { %v409_v27 = vpop.f32.mrf.mxu0  ;;  %v538_v28 = vpop.f32.mrf.mxu1 }
  0xe3   :  { %v410_v29 = vadd.f32 %v409_v27, %v336_v26 }
  0xe4   :  { %v543_v30 = vpop.f32.mrf.mxu0  ;;  %v481_v31 = vpop.f32.mrf.mxu1 }
  0xe5   :  { %v482_v32 = vadd.f32 %v481_v31, %v410_v29 }
  0xe6   :  { %v548_v33 = vpop.f32.mrf.mxu1 }
  0xe7   :  { %v485_v34 = vsub.f32 0.0, %v482_v32 }
  0xe9   :  { %v486_v35 = vmul.f32 1.442695, %v485_v34 }
  0xeb   :  { %553 = vpow2.f32 %v486_v35 }
  0xf8   :  { %v554_v36 = vpop.eup %553 }
  0xf9   :  { %v488_v37 = vadd.f32 1.0, %v554_v36 }
  0xfb   :  { %555 = vrcp.f32 %v488_v37 }
 0x108   :  { %v556_v38 = vpop.eup %555 }
 0x109   :  { %491 = vst.msk [vmem:[#allocation6] sm:$0x1] %vm490_vm2, %v556_v38 }
 0x10a   :  { %588 = shalt.err (!%p585_p9)
}
 0x10b   :  { %501 = dma.vmem_to_hbm [thread:$0]  %s499_s19, 16, %s646_s3, [#allocation5]  }
 0x10c   :  { %599 = dma.done.wait [#allocation5], 16  }
 0x10d   :  { %600 = vsyncadd [#allocation5], 4294967280 }
 0x10e   :  { %505 = vsyncpa [#allocation4], 1 }
 0x10f   :  { %506 = vsyncpa [#allocation5], 1 }

</bundles_post_ra>
